<compile_context>
chip_gen: v7x
topology: tpu7x:2x2x1
jax: 0.10.0
libtpu: 0.0.40
codegen_flags: <defaults>
</compile_context>

<pallas_src>
import functools

import jax
import jax.numpy as jnp
from jax.experimental import pallas as pl
from jax.experimental.pallas import tpu as pltpu

_LANE = 128


def _per_input_block_bytes():
    """Per-input block size in bytes, chosen per TPU generation."""
    # v5e: 16 MiB scoped-VMEM default -> 2 MiB blocks (2 in x 2 bufs = 8 MiB).
    # v6e/v7x: 32 MiB scoped default -> 4 MiB blocks (16 MiB resident).
    try:
        kind = jax.devices()[0].device_kind.lower()
    except Exception:  # pragma: no cover - defensive; default is safe anyway
        kind = ""
    if "v5" in kind:
        return 2 << 20
    return 4 << 20


# ----------------------------------------------------------------------------
# Pallas kernel: streaming (num, den) partial sums for relative MSE.
# ----------------------------------------------------------------------------
def _rel_mse_kernel(yhat_ref, y_ref, out_ref, num_acc, den_acc,
                    *, rows_valid, block_rows):
    i = pl.program_id(0)
    last = pl.num_programs(0) - 1

    @pl.when(i == 0)
    def _init():
        num_acc[...] = jnp.zeros_like(num_acc)
        den_acc[...] = jnp.zeros_like(den_acc)

    # Upcast in-kernel (VPU work hidden under the HBM DMA); accumulate in f32.
    yhat = yhat_ref[...].astype(jnp.float32)
    y = y_ref[...].astype(jnp.float32)

    def _partial(x):
        # Reduce the (block_rows, 128) block to one vreg-sized partial with
        # pure VPU vreg-to-vreg adds (the (8, 128) slabs are exactly vregs).
        if block_rows % 8 == 0:
            return jnp.sum(x.reshape(block_rows // 8, 8, _LANE), axis=0)
        # Tiny single-block fallback (block_rows < 8): XLU sublane reduce,
        # perf-irrelevant at this size.
        return jnp.sum(x, axis=0, keepdims=True)

    def _accumulate(yh, yy):
        d = yh - yy
        num_acc[...] += _partial(d * d)
        den_acc[...] += _partial(yy * yy)

    if rows_valid % block_rows != 0:
        # Only the final grid step can hold the ragged edge block; every other
        # step takes the unmasked fast path (no iota/compare/where VALU work).
        @pl.when(i != last)
        def _body():
            _accumulate(yhat, y)

        @pl.when(i == last)
        def _body_masked():
            row_ids = i * block_rows + jax.lax.broadcasted_iota(
                jnp.int32, yhat.shape, 0)
            valid = row_ids < rows_valid
            _accumulate(jnp.where(valid, yhat, 0.0),
                        jnp.where(valid, y, 0.0))
    else:
        _accumulate(yhat, y)

    # Single small XLU reduction on the final step; two scalar SMEM stores.
    @pl.when(i == last)
    def _finalize():
        out_ref[0, 0] = jnp.sum(num_acc[...])
        out_ref[0, 1] = jnp.sum(den_acc[...])


def _rel_mse_partials(yhat2d, y2d):
    """Returns (num, den) = (sum((yhat-y)^2), sum(y^2)) over a (rows, 128) slab."""
    rows, lanes = yhat2d.shape
    assert lanes == _LANE and y2d.shape == yhat2d.shape
    itemsize = jnp.dtype(yhat2d.dtype).itemsize

    # Block rows sized by bytes (double the rows for bf16), multiple of 8.
    tr_target = max(8, (_per_input_block_bytes() // (_LANE * itemsize)) // 8 * 8)
    tr = rows if rows <= tr_target else tr_target
    grid = (pl.cdiv(rows, tr),)

    acc_rows = 8 if tr % 8 == 0 else 1
    block_bytes = tr * _LANE * itemsize
    # 2 inputs x 2 pipeline buffers x block + accumulators + margin.
    vmem_limit = int(max(4 * block_bytes + (2 << 20), 16 << 20))

    n = rows * lanes
    kernel = functools.partial(_rel_mse_kernel, rows_valid=rows, block_rows=tr)

    out = pl.pallas_call(
        kernel,
        out_shape=jax.ShapeDtypeStruct((1, 2), jnp.float32),
        grid_spec=pltpu.PrefetchScalarGridSpec(
            num_scalar_prefetch=0,
            grid=grid,
            in_specs=[
                pl.BlockSpec((tr, _LANE), lambda i: (i, 0)),
                pl.BlockSpec((tr, _LANE), lambda i: (i, 0)),
            ],
            # (num, den) partials live in SMEM; written only on the last step.
            out_specs=pl.BlockSpec(memory_space=pltpu.MemorySpace.SMEM),
            scratch_shapes=[
                pltpu.VMEM((acc_rows, _LANE), jnp.float32),  # num accumulator
                pltpu.VMEM((acc_rows, _LANE), jnp.float32),  # den accumulator
            ],
        ),
        compiler_params=pltpu.CompilerParams(
            dimension_semantics=("arbitrary",),  # accumulator carried axis
            vmem_limit_bytes=vmem_limit,
        ),
        cost_estimate=pl.CostEstimate(
            flops=5 * n,  # sub, 2 squares, 2 accumulate adds
            transcendentals=0,
            bytes_accessed=2 * n * itemsize + 8,
        ),
    )(yhat2d, y2d)
    return out[0, 0], out[0, 1]


# ----------------------------------------------------------------------------
# Module-equivalents (plain Python classes; no parameters in __init__)
# ----------------------------------------------------------------------------
class LossFunc:
    """JAX equivalent of the abstract PyTorch LossFunc base class."""

    def __init__(self, eps=1e-06):
        self.eps = eps

    def forward(self, yhat, y):
        # Exact semantics of the abstract reference forward:
        #   loss = []
        #   return loss
        # TODO(synk): abstract method has no tensor compute; nothing to lower.
        loss = []
        return loss

    def __call__(self, yhat, y):
        return self.forward(yhat, y)


class EpsRelativeMSELoss(LossFunc):
    """Concrete subclass whose hot path runs in a tiled Pallas reduction."""

    def forward(self, yhat, y):
        assert yhat.shape == y.shape
        n = int(yhat.size)
        if n == 0:
            # sum of empty tensors: 0 / (0 + eps) == 0
            return jnp.float32(0.0)

        yhat_flat = jnp.ravel(yhat)
        y_flat = jnp.ravel(y)
        n_main = (n // _LANE) * _LANE

        num = jnp.float32(0.0)
        den = jnp.float32(0.0)

        if n_main:
            if n_main == n:
                # Common case: copy-free reshape of the original-dtype tensor.
                yh2 = yhat_flat.reshape(-1, _LANE)
                yy2 = y_flat.reshape(-1, _LANE)
            else:
                yh2 = yhat_flat[:n_main].reshape(-1, _LANE)
                yy2 = y_flat[:n_main].reshape(-1, _LANE)
            num, den = _rel_mse_partials(yh2, yy2)

        if n_main < n:
            # Fold the <128-element lane tail in the wrapper — no full-tensor
            # jnp.pad copy in this bandwidth-bound path.
            t_yh = yhat_flat[n_main:].astype(jnp.float32)
            t_y = y_flat[n_main:].astype(jnp.float32)
            d = t_yh - t_y
            num = num + jnp.sum(d * d)
            den = den + jnp.sum(t_y * t_y)

        return num / (den + jnp.float32(self.eps))


# ----------------------------------------------------------------------------
# Demo / self-test
# ----------------------------------------------------------------------------
if __name__ == "__main__":
    key = jax.random.PRNGKey(0)
    k1, k2, k3, k4 = jax.random.split(key, 4)

    # Small NCHW inputs: batch=2, channels=4, spatial=16x16
    yhat = jax.random.normal(k1, (2, 4, 16, 16), dtype=jnp.float32)
    y = jax.random.normal(k2, (2, 4, 16, 16), dtype=jnp.float32)

    # Base class: exact reference semantics (returns empty list).
    base = LossFunc(eps=1e-06)
    base_out = base(yhat, y)
    assert base_out == []

    # Concrete subclass: Pallas kernel hot path (lane-aligned case).
    loss_fn = EpsRelativeMSELoss(eps=1e-06)
    loss = jax.block_until_ready(loss_fn(yhat, y))

    d = yhat - y
    ref = jnp.sum(d * d) / (jnp.sum(y * y) + 1e-06)
    assert jnp.allclose(loss, ref, rtol=1e-5, atol=1e-5), (loss, ref)

    # Ragged case: 257 elements -> 2 full lane rows in the kernel + 1-elem tail.
    yhat_r = jax.random.normal(k3, (257,), dtype=jnp.float32)
    y_r = jax.random.normal(k4, (257,), dtype=jnp.float32)
    loss_r = jax.block_until_ready(loss_fn(yhat_r, y_r))
    d_r = yhat_r - y_r
    ref_r = jnp.sum(d_r * d_r) / (jnp.sum(y_r * y_r) + 1e-06)
    assert jnp.allclose(loss_r, ref_r, rtol=1e-5, atol=1e-5), (loss_r, ref_r)

    print("KERNEL_OK")
</pallas_src>

<mosaic_0001>
module attributes {stable_mosaic.version = 11 : i64} {
  func.func @_rel_mse_kernel(%arg0: i32, %arg1: memref<16x128xf32, #tpu.memory_space<vmem>>, %arg2: memref<16x128xf32, #tpu.memory_space<vmem>>, %arg3: memref<1x2xf32, #tpu.memory_space<smem>>, %arg4: memref<8x128xf32, #tpu.memory_space<vmem>>, %arg5: memref<8x128xf32, #tpu.memory_space<vmem>>) attributes {dimension_semantics = [#tpu.dimension_semantics<arbitrary>], iteration_bounds = array<i64: 1>, scalar_prefetch = 0 : i64, scratch_operands = 2 : i64, tpu.core_type = #tpu.core_type<tc>, window_params = [{transform_indices = @transform_0, window_bounds = array<i64: 16, 128>}, {transform_indices = @transform_1, window_bounds = array<i64: 16, 128>}, {transform_indices = @transform_2, window_bounds = array<i64: 1, 2>}]} {
    %c0_i32 = arith.constant 0 : i32
    %0 = arith.cmpi eq, %arg0, %c0_i32 : i32
    %1 = arith.extui %0 : i1 to i32
    %c0_i32_0 = arith.constant 0 : i32
    %2 = arith.cmpi ne, %1, %c0_i32_0 : i32
    scf.if %2 {
      %cst_15 = arith.constant 0.000000e+00 : f32
      %21 = vector.broadcast %cst_15 : f32 to vector<8x128xf32>
      %c0_16 = arith.constant 0 : index
      %c0_17 = arith.constant 0 : index
      %22 = vector.load %arg4[%c0_16, %c0_17] : memref<8x128xf32, #tpu.memory_space<vmem>>, vector<8x128xf32>
      tpu.vector_store %arg4[%c0_16, %c0_17], %21 {strides = array<i32>} : memref<8x128xf32, #tpu.memory_space<vmem>>, vector<8x128xf32>,
      %cst_18 = arith.constant 0.000000e+00 : f32
      %23 = vector.broadcast %cst_18 : f32 to vector<8x128xf32>
      %c0_19 = arith.constant 0 : index
      %c0_20 = arith.constant 0 : index
      %24 = vector.load %arg5[%c0_19, %c0_20] : memref<8x128xf32, #tpu.memory_space<vmem>>, vector<8x128xf32>
      tpu.vector_store %arg5[%c0_19, %c0_20], %23 {strides = array<i32>} : memref<8x128xf32, #tpu.memory_space<vmem>>, vector<8x128xf32>,
    } else {
    }
    %c0 = arith.constant 0 : index
    %c0_1 = arith.constant 0 : index
    %3 = vector.load %arg1[%c0, %c0_1] : memref<16x128xf32, #tpu.memory_space<vmem>>, vector<16x128xf32>
    %c0_2 = arith.constant 0 : index
    %c0_3 = arith.constant 0 : index
    %4 = vector.load %arg2[%c0_2, %c0_3] : memref<16x128xf32, #tpu.memory_space<vmem>>, vector<16x128xf32>
    %5 = arith.subf %3, %4 : vector<16x128xf32>
    %c0_4 = arith.constant 0 : index
    %c0_5 = arith.constant 0 : index
    %6 = vector.load %arg4[%c0_4, %c0_5] : memref<8x128xf32, #tpu.memory_space<vmem>>, vector<8x128xf32>
    %7 = arith.mulf %5, %5 : vector<16x128xf32>
    %8 = vector.shape_cast %7 : vector<16x128xf32> to vector<2x8x128xf32>
    %cst = arith.constant dense<0.000000e+00> : vector<8x128xf32>
    %9 = vector.multi_reduction <add>, %8, %cst [0] : vector<2x8x128xf32> to vector<8x128xf32>
    %10 = arith.addf %6, %9 : vector<8x128xf32>
    %c0_6 = arith.constant 0 : index
    %c0_7 = arith.constant 0 : index
    %11 = vector.load %arg4[%c0_6, %c0_7] : memref<8x128xf32, #tpu.memory_space<vmem>>, vector<8x128xf32>
    tpu.vector_store %arg4[%c0_6, %c0_7], %10 {strides = array<i32>} : memref<8x128xf32, #tpu.memory_space<vmem>>, vector<8x128xf32>,
    %c0_8 = arith.constant 0 : index
    %c0_9 = arith.constant 0 : index
    %12 = vector.load %arg5[%c0_8, %c0_9] : memref<8x128xf32, #tpu.memory_space<vmem>>, vector<8x128xf32>
    %13 = arith.mulf %4, %4 : vector<16x128xf32>
    %14 = vector.shape_cast %13 : vector<16x128xf32> to vector<2x8x128xf32>
    %cst_10 = arith.constant dense<0.000000e+00> : vector<8x128xf32>
    %15 = vector.multi_reduction <add>, %14, %cst_10 [0] : vector<2x8x128xf32> to vector<8x128xf32>
    %16 = arith.addf %12, %15 : vector<8x128xf32>
    %c0_11 = arith.constant 0 : index
    %c0_12 = arith.constant 0 : index
    %17 = vector.load %arg5[%c0_11, %c0_12] : memref<8x128xf32, #tpu.memory_space<vmem>>, vector<8x128xf32>
    tpu.vector_store %arg5[%c0_11, %c0_12], %16 {strides = array<i32>} : memref<8x128xf32, #tpu.memory_space<vmem>>, vector<8x128xf32>,
    %c0_i32_13 = arith.constant 0 : i32
    %18 = arith.cmpi eq, %arg0, %c0_i32_13 : i32
    %19 = arith.extui %18 : i1 to i32
    %c0_i32_14 = arith.constant 0 : i32
    %20 = arith.cmpi ne, %19, %c0_i32_14 : i32
    scf.if %20 {
      %c0_15 = arith.constant 0 : index
      %c0_16 = arith.constant 0 : index
      %21 = vector.load %arg4[%c0_15, %c0_16] : memref<8x128xf32, #tpu.memory_space<vmem>>, vector<8x128xf32>
      %22 = vector.shape_cast %21 : vector<8x128xf32> to vector<1x8x128xf32>
      %cst_17 = arith.constant dense<0.000000e+00> : vector<1xf32>
      %23 = vector.multi_reduction <add>, %22, %cst_17 [1, 2] : vector<1x8x128xf32> to vector<1xf32>
      %24 = vector.shape_cast %23 : vector<1xf32> to vector<1x1x1xf32>
      %25 = vector.extract %24[0, 0, 0] : f32 from vector<1x1x1xf32>
      %c0_18 = arith.constant 0 : index
      %c0_19 = arith.constant 0 : index
      %26 = memref.load %arg3[%c0_18, %c0_19] : memref<1x2xf32, #tpu.memory_space<smem>>
      memref.store %25, %arg3[%c0_18, %c0_19] : memref<1x2xf32, #tpu.memory_space<smem>>
      %c0_20 = arith.constant 0 : index
      %c0_21 = arith.constant 0 : index
      %27 = vector.load %arg5[%c0_20, %c0_21] : memref<8x128xf32, #tpu.memory_space<vmem>>, vector<8x128xf32>
      %28 = vector.shape_cast %27 : vector<8x128xf32> to vector<1x8x128xf32>
      %cst_22 = arith.constant dense<0.000000e+00> : vector<1xf32>
      %29 = vector.multi_reduction <add>, %28, %cst_22 [1, 2] : vector<1x8x128xf32> to vector<1xf32>
      %30 = vector.shape_cast %29 : vector<1xf32> to vector<1x1x1xf32>
      %31 = vector.extract %30[0, 0, 0] : f32 from vector<1x1x1xf32>
      %c0_23 = arith.constant 0 : index
      %c1 = arith.constant 1 : index
      %32 = memref.load %arg3[%c0_23, %c1] : memref<1x2xf32, #tpu.memory_space<smem>>
      memref.store %31, %arg3[%c0_23, %c1] : memref<1x2xf32, #tpu.memory_space<smem>>
    } else {
    }
    return
  }
  func.func @transform_0(%arg0: i32) -> (i32, i32) {
    %c0_i32 = arith.constant 0 : i32
    %c0_i32_0 = arith.constant 0 : i32
    return %arg0, %c0_i32 : i32, i32
  }
  func.func @transform_1(%arg0: i32) -> (i32, i32) {
    %c0_i32 = arith.constant 0 : i32
    %c0_i32_0 = arith.constant 0 : i32
    return %arg0, %c0_i32 : i32, i32
  }
  func.func @transform_2(%arg0: i32) -> (i32, i32) {
    %c0_i32 = arith.constant 0 : i32
    %c0_i32_0 = arith.constant 0 : i32
    %c0_i32_1 = arith.constant 0 : i32
    return %c0_i32, %c0_i32_0 : i32, i32
  }
}

</mosaic_0001>

<bundles_post_ra>
// kernel: tpu_custom_call.1
= control target key start
LH: loop header
LB: loop body
LE: loop exit
PB: predicated region body
PF: predicated region fallthrough
CT: control target
= control target key end

     0   :  { %7 = vsyncpa [#allocation5], 0  ;;  %s231_s0 = inlined_call_operand.hbm [shape: f32[16,128], index: 0, kind: input, shape index: {}]   ;;  %s232_s1 = inlined_call_operand.hbm [shape: f32[16,128], index: 1, kind: input, shape index: {}]   ;;  %s233_s2 = inlined_call_operand.hbm [shape: f32[1,2], index: 2, kind: output, shape index: {}]  }
   0x1   :  { %8 = vsyncpa [#allocation8], 0 }
   0x2   :  { %9 = vsyncpa [#allocation6], 0  ;;  %s175_s9 = smov [#allocation4]   ;;  %s115_s13 = scalar_lea.hbm %s231_s0, 256 }
   0x3   :  { %s15_s10 = sshll.u32 %s175_s9, 4  ;;  %p116_p0 = scmp.ne.s32.totalorder %s231_s0, %s115_s13  ;;  %s16_s10 = int_to_ptr.vmem [resolvable:$true] %s15_s10 }
   0x4   :  { %p119_p1 = scmp.lt.u32.totalorder %s115_s13, %s231_s0 }
   0x6   :  { %p121_p2 = pnand %p119_p1, %p116_p0 }
   0x8   :  { %124 = shalt.err (!%p121_p2)
}
   0x9   :  { %s125_s18 = scalar_lea.vmem %s16_s10, 256  ;;  %p130_p4 = scmp.lt.s32.totalorder %s16_s10, %s16_s10 }
   0xa   :  { %p126_p3 = scmp.ne.s32.totalorder %s16_s10, %s125_s18  ;;  %p131_p5 = scmp.lt.s32.totalorder %s125_s18, %s125_s18 }
   0xc   :  { %p132_p6 = por %p131_p5, %p130_p4 }
   0xe   :  { %p133_p7 = pnand %p132_p6, %p126_p3 }
  0x10   :  { %136 = shalt.err (!%p133_p7)
}
  0x11   :  { %s176_s19 = smov 128   ;;  %s177_s20 = smov 8  }
  0x12   :  { %21 = dma.hbm_to_vmem [thread:$0]  %s231_s0, 256, %s16_s10, [#allocation5], %s176_s19, %s176_s19, %s177_s20  }
  0x13   :  { %s178_s23 = smov [#allocation7]   ;;  %s137_s27 = scalar_lea.hbm %s232_s1, 256 }
  0x14   :  { %s27_s24 = sshll.u32 %s178_s23, 4  ;;  %p138_p8 = scmp.ne.s32.totalorder %s232_s1, %s137_s27  ;;  %s28_s24 = int_to_ptr.vmem [resolvable:$true] %s27_s24 }
  0x15   :  { %p141_p9 = scmp.lt.u32.totalorder %s137_s27, %s232_s1 }
  0x17   :  { %p143_p10 = pnand %p141_p9, %p138_p8 }
  0x19   :  { %146 = shalt.err (!%p143_p10)
}
  0x1a   :  { %s147_s4 = scalar_lea.vmem %s28_s24, 256  ;;  %p152_p12 = scmp.lt.s32.totalorder %s28_s24, %s28_s24 }
  0x1b   :  { %p148_p11 = scmp.ne.s32.totalorder %s28_s24, %s147_s4  ;;  %p153_p13 = scmp.lt.s32.totalorder %s147_s4, %s147_s4 }
  0x1d   :  { %p154_p0 = por %p153_p13, %p152_p12 }
  0x1f   :  { %p155_p1 = pnand %p154_p0, %p148_p11 }
  0x21   :  { %158 = shalt.err (!%p155_p1)
}
  0x22   :  { %33 = dma.hbm_to_vmem [thread:$0]  %s232_s1, 256, %s28_s24, [#allocation8], %s176_s19, %s176_s19, %s177_s20  }
  0x23   :  { %169 = dma.done.wait [#allocation5], 256  }
  0x24   :  { %170 = vsyncadd [#allocation5], 4294967040 }
  0x25   :  { %171 = dma.done.wait [#allocation8], 256  }
  0x26   :  { %172 = vsyncadd [#allocation8], 4294967040  ;;  %v46_v0 = vld [vmem:[#allocation4] sm:$0xff]  ;;  %v47_v1 = vld [vmem:[#allocation4 + $0x8] sm:$0xff]  ;;  %s159_s9 = scalar_lea.hbm %s233_s2, 16 }
  0x27   :  { %v48_v2 = vld [vmem:[#allocation7] sm:$0xff]  ;;  %v49_v3 = vld [vmem:[#allocation7 + $0x8] sm:$0xff]  ;;  %p160_p2 = scmp.ne.s32.totalorder %s233_s2, %s159_s9  ;;  %p163_p3 = scmp.lt.u32.totalorder %s159_s9, %s233_s2 }
  0x28   :  { %v50_v4 = vsub.f32 %v46_v0, %v48_v2  ;;  %v51_v5 = vsub.f32 %v47_v1, %v49_v3  ;;  %v59_v8 = vmul.f32 %v48_v2, %v48_v2  ;;  %v60_v9 = vmul.f32 %v49_v3, %v49_v3 }
  0x29   :  { %p165_p4 = pnand %p163_p3, %p160_p2 }
  0x2a   :  { %v53_v6 = vmul.f32 %v50_v4, %v50_v4  ;;  %v54_v7 = vmul.f32 %v51_v5, %v51_v5  ;;  %v61_v11 = vadd.f32 %v60_v9, %v59_v8 }
  0x2c   :  { %v55_v10 = vadd.f32 %v54_v7, %v53_v6 }
  0x2e   :  { %68 = vadd.xlane.f32.xlu0 %v55_v10 }
  0x32   :  { %80 = vadd.xlane.f32.xlu0 %v61_v11 }
  0xbb   :  { %v69_v12 = vpop.xlane.xlu0 %68 }
  0xbc   :  { %v70_v13 = vrot.slane %v69_v12, 4 }
  0xbe   :  { %v71_v14 = vadd.f32 %v70_v13, %v69_v12 }
  0xbf   :  { %v81_v15 = vpop.xlane.xlu0 %80 }
  0xc0   :  { %v72_v16 = vrot.slane %v71_v14, 2  ;;  %v82_v17 = vrot.slane %v81_v15, 4 }
  0xc2   :  { %v83_v18 = vadd.f32 %v82_v17, %v81_v15  ;;  %v73_v19 = vadd.f32 %v72_v16, %v71_v14 }
  0xc4   :  { %v84_v20 = vrot.slane %v83_v18, 2  ;;  %v74_v21 = vrot.slane %v73_v19, 1 }
  0xc6   :  { %v85_v22 = vadd.f32 %v84_v20, %v83_v18  ;;  %v75_v23 = vadd.f32 %v74_v21, %v73_v19 }
  0xc8   :  { %106 = vpush %v75_v23  ;;  %v86_v24 = vrot.slane %v85_v22, 1 }
  0xca   :  { %v87_v25 = vadd.f32 %v86_v24, %v85_v22 }
  0xcc   :  { %108 = vpush %v87_v25 }
  0xf9   :  { %s107_s1 = spop %106 }
  0xfa   :  { %78 = sst [smem:[#allocation9]] %s107_s1 }
  0xfd   :  { %s109_s6 = spop %108 }
  0xfe   :  { %90 = sst [smem:[#allocation9 + $0x1]] %s109_s6 }
  0xff   :  { %168 = shalt.err (!%p165_p4)
}
 0x100   :  { %s179_s14 = smov [#allocation9]  }
 0x101   :  { %98 = dma.smem_to_hbm %s179_s14, 16, %s233_s2, [#allocation6]  }
 0x102   :  { %173 = dma.done.wait [#allocation6], 16  }
 0x103   :  { %174 = vsyncadd [#allocation6], 4294967280 }
 0x104   :  { %102 = sfence }
 0x105   :  { %103 = vsyncpa [#allocation5], 1 }
 0x106   :  { %104 = vsyncpa [#allocation8], 1 }
 0x107   :  { %105 = vsyncpa [#allocation6], 1 }

</bundles_post_ra>
